<compile_context>
chip_gen: v7x
topology: tpu7x:2x2x1
jax: 0.10.0
libtpu: 0.0.40
codegen_flags: <defaults>
</compile_context>

<pallas_src>
import functools

import jax
import jax.numpy as jnp
from jax.experimental import pallas as pl
from jax.experimental.pallas import tpu as pltpu


def _round_up(x, m):
    return ((x + m - 1) // m) * m


def _ms_kernel(*refs, inv_c, has_mask):
    if has_mask:
        y_ref, t_ref, m_ref, o_ref = refs
    else:
        y_ref, t_ref, o_ref = refs
        m_ref = None

    i = pl.program_id(1)  # inner (sequential) axis over batch tiles

    # Output block index depends only on the parallel axis -> it stays
    # resident in VMEM across the reduction axis and acts as the accumulator.
    @pl.when(i == 0)
    def _():
        o_ref[...] = jnp.zeros_like(o_ref)

    # Softmax over the class axis (sublanes); batch lives on the lane axis.
    y = y_ref[...].astype(jnp.float32)                        # (C, TB)
    y = y - jnp.max(y, axis=0, keepdims=True)
    e = jnp.exp(y)
    p = e * pl.reciprocal(jnp.sum(e, axis=0, keepdims=True), approx=True)

    d = p - t_ref[...].astype(jnp.float32)                    # (C, TB)
    per_sample = jnp.sum(d * d, axis=0, keepdims=True) * inv_c  # (1, TB)
    if has_mask:
        per_sample = per_sample * m_ref[...]

    o_ref[...] += per_sample                                  # lane-wide accum


def mean_squared_pallas(y, target, mask=None, *, block_n=None, num_chunks=2,
                        vmem_budget_bytes=8 << 20):
    """Pallas implementation of mean_squared(y, target, mask); y is (N, C)."""
    n, c = y.shape
    assert target.shape == (n, c)

    # ---- lane-dense layout: (N, C) -> (C, N) (layout plumbing, small C) ----
    yt = jnp.transpose(y)
    tt = jnp.transpose(target)

    # ---- tile sizing: biggest lane tile that fits the VMEM budget ----------
    if block_n is None:
        # 2 double-buffered f32 (C, TB) input streams + mask row + output row
        bytes_per_col = 2 * c * 4 * 2 + 4 * 2 + 4 * 2
        block_n = vmem_budget_bytes // bytes_per_col
    block_n = max(128, min((int(block_n) // 128) * 128, 4096))
    block_n = min(block_n, _round_up(n, 128))  # don't over-tile tiny batches

    # Leading "parallel" axis -> up to 2 TensorCores on v7x.
    chunks = max(1, min(int(num_chunks), -(-n // block_n)))
    n_pad = _round_up(n, chunks * block_n)
    steps = n_pad // (chunks * block_n)        # sequential steps per chunk
    pad = n_pad - n

    # Padded columns contribute exactly zero loss:
    #   logits 0 -> softmax = 1/C ; target = 1/C -> diff = 0  (no-mask path)
    #   mask padded with 0 zeroes them anyway     (masked path)
    yt = jnp.pad(yt, ((0, 0), (0, pad)))
    tt = jnp.pad(tt, ((0, 0), (0, pad)), constant_values=1.0 / c)

    has_mask = mask is not None
    operands = [yt, tt]
    in_specs = [
        pl.BlockSpec((c, block_n), lambda p, i: (0, p * steps + i)),
        pl.BlockSpec((c, block_n), lambda p, i: (0, p * steps + i)),
    ]
    if has_mask:
        m = jnp.reshape(mask, (1, n)).astype(jnp.float32)
        m = jnp.pad(m, ((0, 0), (0, pad)))
        operands.append(m)
        in_specs.append(
            pl.BlockSpec((1, block_n), lambda p, i: (0, p * steps + i)))

    kernel = functools.partial(_ms_kernel, inv_c=1.0 / c, has_mask=has_mask)

    out = pl.pallas_call(
        kernel,
        out_shape=jax.ShapeDtypeStruct((1, chunks * block_n), jnp.float32),
        grid_spec=pltpu.PrefetchScalarGridSpec(
            num_scalar_prefetch=0,
            grid=(chunks, steps),
            in_specs=in_specs,
            out_specs=pl.BlockSpec((1, block_n), lambda p, i: (0, p)),
        ),
        compiler_params=pltpu.CompilerParams(
            dimension_semantics=("parallel", "arbitrary"),
            vmem_limit_bytes=32 << 20,  # explicit: portable to v7x's 64 MiB
        ),
    )(*operands)

    # Tiny final reduction (<= chunks*block_n f32) done by XLA.
    return jnp.sum(out) * (1.0 / n)


class MeanSquaredPallas:
    """Mirror of the PyTorch MeanSquared module."""

    def __init__(self, use_onehot=False, num_classes=10):
        self.use_onehot = use_onehot
        self.num_classes = num_classes

    def _make_one_hot(self, y):
        return jnp.eye(self.num_classes, dtype=jnp.float32)[y]

    def __call__(self, y, target, mask=None):
        if self.use_onehot:
            target = self._make_one_hot(target)
        target = jax.lax.stop_gradient(target)  # .detach()
        return mean_squared_pallas(y, target, mask)


def _reference(y, target, mask=None):
    p = jax.nn.softmax(y, axis=1)
    loss = jnp.mean((p - target) ** 2, axis=1)
    if mask is not None:
        loss = mask * loss
    return jnp.mean(loss)


if __name__ == "__main__":
    key = jax.random.PRNGKey(0)
    k1, k2, k3, k4 = jax.random.split(key, 4)

    n, c = 16, 10  # small shapes: batch=16, num_classes=10
    y = jax.random.normal(k1, (n, c), dtype=jnp.float32)
    target_logits = jax.random.normal(k2, (n, c), dtype=jnp.float32)
    target = jax.nn.softmax(target_logits, axis=1)
    mask = (jax.random.uniform(k3, (n,)) > 0.3).astype(jnp.float32)
    labels = jax.random.randint(k4, (n,), 0, c)

    # case 1: soft targets + mask
    mod = MeanSquaredPallas(use_onehot=False, num_classes=c)
    out = mod(y, target, mask)
    ref = _reference(y, target, mask)

    # case 2: one-hot targets, no mask (exercises the maskless kernel variant)
    mod_oh = MeanSquaredPallas(use_onehot=True, num_classes=c)
    out_oh = mod_oh(y, labels)
    ref_oh = _reference(y, jnp.eye(c, dtype=jnp.float32)[labels])

    # case 3: multi-tile + 2-chunk parallel axis + batch padding path
    n2 = 160
    y2 = jax.random.normal(k1, (n2, c), dtype=jnp.float32)
    t2 = jax.nn.softmax(jax.random.normal(k2, (n2, c), dtype=jnp.float32), axis=1)
    m2 = (jax.random.uniform(k3, (n2,)) > 0.5).astype(jnp.float32)
    out2 = mean_squared_pallas(y2, t2, m2, block_n=128, num_chunks=2)
    ref2 = _reference(y2, t2, m2)

    jax.block_until_ready((out, out_oh, out2))

    # approx=True softmax reciprocal perturbs the loss at the ~1e-3 relative
    # level (fine for a training loss), so compare with a loose tolerance.
    assert jnp.allclose(out, ref, rtol=2e-2, atol=1e-4), (out, ref)
    assert jnp.allclose(out_oh, ref_oh, rtol=2e-2, atol=1e-4), (out_oh, ref_oh)
    assert jnp.allclose(out2, ref2, rtol=2e-2, atol=1e-4), (out2, ref2)

    print("KERNEL_OK")
</pallas_src>

<mosaic_0001>
module attributes {stable_mosaic.version = 11 : i64} {
  func.func @_ms_kernel(%arg0: i32, %arg1: i32, %arg2: memref<10x128xf32, #tpu.memory_space<vmem>>, %arg3: memref<10x128xf32, #tpu.memory_space<vmem>>, %arg4: memref<1x128xf32, #tpu.memory_space<vmem>>, %arg5: memref<1x128xf32, #tpu.memory_space<vmem>>) attributes {dimension_semantics = [#tpu.dimension_semantics<parallel>, #tpu.dimension_semantics<arbitrary>], iteration_bounds = array<i64: 1, 1>, scalar_prefetch = 0 : i64, scratch_operands = 0 : i64, tpu.core_type = #tpu.core_type<tc>, window_params = [{transform_indices = @transform_0, window_bounds = array<i64: 10, 128>}, {transform_indices = @transform_1, window_bounds = array<i64: 10, 128>}, {transform_indices = @transform_2, window_bounds = array<i64: 1, 128>}, {transform_indices = @transform_3, window_bounds = array<i64: 1, 128>}]} {
    %c0_i32 = arith.constant 0 : i32
    %0 = arith.cmpi eq, %arg1, %c0_i32 : i32
    %1 = arith.extui %0 : i1 to i32
    %c0_i32_0 = arith.constant 0 : i32
    %2 = arith.cmpi ne, %1, %c0_i32_0 : i32
    scf.if %2 {
      %cst_13 = arith.constant 0.000000e+00 : f32
      %26 = vector.broadcast %cst_13 : f32 to vector<1x128xf32>
      %c0_14 = arith.constant 0 : index
      %c0_15 = arith.constant 0 : index
      %27 = vector.load %arg5[%c0_14, %c0_15] : memref<1x128xf32, #tpu.memory_space<vmem>>, vector<1x128xf32>
      tpu.vector_store %arg5[%c0_14, %c0_15], %26 {strides = array<i32>} : memref<1x128xf32, #tpu.memory_space<vmem>>, vector<1x128xf32>,
    } else {
    }
    %c0 = arith.constant 0 : index
    %c0_1 = arith.constant 0 : index
    %3 = vector.load %arg2[%c0, %c0_1] : memref<10x128xf32, #tpu.memory_space<vmem>>, vector<10x128xf32>
    %cst = arith.constant dense<0xFF800000> : vector<128xf32>
    %4 = vector.multi_reduction <maximumf>, %3, %cst [0] : vector<10x128xf32> to vector<128xf32>
    %5 = vector.shape_cast %4 : vector<128xf32> to vector<1x128xf32>
    %6 = vector.broadcast %5 : vector<1x128xf32> to vector<10x128xf32>
    %7 = arith.subf %3, %6 : vector<10x128xf32>
    %8 = math.exp %7 : vector<10x128xf32>
    %cst_2 = arith.constant dense<0.000000e+00> : vector<128xf32>
    %9 = vector.multi_reduction <add>, %8, %cst_2 [0] : vector<10x128xf32> to vector<128xf32>
    %10 = vector.shape_cast %9 : vector<128xf32> to vector<1x128xf32>
    %11 = tpu.reciprocal %10 {approx = true} : vector<1x128xf32> -> vector<1x128xf32>
    %12 = vector.broadcast %11 : vector<1x128xf32> to vector<10x128xf32>
    %13 = arith.mulf %8, %12 : vector<10x128xf32>
    %c0_3 = arith.constant 0 : index
    %c0_4 = arith.constant 0 : index
    %14 = vector.load %arg3[%c0_3, %c0_4] : memref<10x128xf32, #tpu.memory_space<vmem>>, vector<10x128xf32>
    %15 = arith.subf %13, %14 : vector<10x128xf32>
    %16 = arith.mulf %15, %15 : vector<10x128xf32>
    %cst_5 = arith.constant dense<0.000000e+00> : vector<128xf32>
    %17 = vector.multi_reduction <add>, %16, %cst_5 [0] : vector<10x128xf32> to vector<128xf32>
    %18 = vector.shape_cast %17 : vector<128xf32> to vector<1x128xf32>
    %cst_6 = arith.constant 1.000000e-01 : f32
    %19 = vector.broadcast %cst_6 : f32 to vector<1x128xf32>
    %20 = arith.mulf %18, %19 : vector<1x128xf32>
    %c0_7 = arith.constant 0 : index
    %c0_8 = arith.constant 0 : index
    %21 = vector.load %arg4[%c0_7, %c0_8] : memref<1x128xf32, #tpu.memory_space<vmem>>, vector<1x128xf32>
    %22 = arith.mulf %20, %21 : vector<1x128xf32>
    %c0_9 = arith.constant 0 : index
    %c0_10 = arith.constant 0 : index
    %23 = vector.load %arg5[%c0_9, %c0_10] : memref<1x128xf32, #tpu.memory_space<vmem>>, vector<1x128xf32>
    %24 = arith.addf %23, %22 : vector<1x128xf32>
    %c0_11 = arith.constant 0 : index
    %c0_12 = arith.constant 0 : index
    %25 = vector.load %arg5[%c0_11, %c0_12] : memref<1x128xf32, #tpu.memory_space<vmem>>, vector<1x128xf32>
    tpu.vector_store %arg5[%c0_11, %c0_12], %24 {strides = array<i32>} : memref<1x128xf32, #tpu.memory_space<vmem>>, vector<1x128xf32>,
    return
  }
  func.func @transform_0(%arg0: i32, %arg1: i32) -> (i32, i32) {
    %c1_i32 = arith.constant 1 : i32
    %0 = arith.muli %arg0, %c1_i32 : i32
    %1 = arith.addi %0, %arg1 : i32
    %c0_i32 = arith.constant 0 : i32
    %c0_i32_0 = arith.constant 0 : i32
    return %c0_i32, %1 : i32, i32
  }
  func.func @transform_1(%arg0: i32, %arg1: i32) -> (i32, i32) {
    %c1_i32 = arith.constant 1 : i32
    %0 = arith.muli %arg0, %c1_i32 : i32
    %1 = arith.addi %0, %arg1 : i32
    %c0_i32 = arith.constant 0 : i32
    %c0_i32_0 = arith.constant 0 : i32
    return %c0_i32, %1 : i32, i32
  }
  func.func @transform_2(%arg0: i32, %arg1: i32) -> (i32, i32) {
    %c1_i32 = arith.constant 1 : i32
    %0 = arith.muli %arg0, %c1_i32 : i32
    %1 = arith.addi %0, %arg1 : i32
    %c0_i32 = arith.constant 0 : i32
    %c0_i32_0 = arith.constant 0 : i32
    return %c0_i32, %1 : i32, i32
  }
  func.func @transform_3(%arg0: i32, %arg1: i32) -> (i32, i32) {
    %c0_i32 = arith.constant 0 : i32
    %c0_i32_0 = arith.constant 0 : i32
    return %c0_i32, %arg0 : i32, i32
  }
}

</mosaic_0001>

<bundles_post_ra>
// kernel: tpu_custom_call.1
= control target key start
LH: loop header
LB: loop body
LE: loop exit
PB: predicated region body
PF: predicated region fallthrough
CT: control target
= control target key end

     0   :  { %8 = vsyncpa [#allocation3], 0  ;;  %s289_s0 = inlined_call_operand.hbm [shape: f32[10,128], index: 0, kind: input, shape index: {}]   ;;  %s290_s1 = inlined_call_operand.hbm [shape: f32[10,128], index: 1, kind: input, shape index: {}]   ;;  %s291_s2 = inlined_call_operand.vmem [shape: f32[1,128], index: 2, kind: input, shape index: {}]   ;;  %s292_s3 = inlined_call_operand.hbm [shape: f32[1,128], index: 3, kind: output, shape index: {}]  }
   0x1   :  { %9 = vsyncpa [#allocation6], 0 }
   0x2   :  { %10 = vsyncpa [#allocation4], 0  ;;  %s221_s12 = smov [#allocation2]   ;;  %s149_s16 = scalar_lea.hbm %s289_s0, 256 }
   0x3   :  { %s19_s13 = sshll.u32 %s221_s12, 4  ;;  %p150_p0 = scmp.ne.s32.totalorder %s289_s0, %s149_s16  ;;  %s20_s13 = int_to_ptr.vmem [resolvable:$true] %s19_s13 }
   0x4   :  { %p153_p1 = scmp.lt.u32.totalorder %s149_s16, %s289_s0 }
   0x6   :  { %p155_p2 = pnand %p153_p1, %p150_p0 }
   0x8   :  { %158 = shalt.err (!%p155_p2)
}
   0x9   :  { %s159_s21 = scalar_lea.vmem %s20_s13, 256  ;;  %p164_p4 = scmp.lt.s32.totalorder %s20_s13, %s20_s13 }
   0xa   :  { %p160_p3 = scmp.ne.s32.totalorder %s20_s13, %s159_s21  ;;  %p165_p5 = scmp.lt.s32.totalorder %s159_s21, %s159_s21 }
   0xc   :  { %p166_p6 = por %p165_p5, %p164_p4 }
   0xe   :  { %p167_p7 = pnand %p166_p6, %p160_p3 }
  0x10   :  { %170 = shalt.err (!%p167_p7)
}
  0x11   :  { %s222_s22 = smov 128   ;;  %s223_s23 = smov 8  }
  0x12   :  { %25 = dma.hbm_to_vmem [thread:$0]  %s289_s0, 256, %s20_s13, [#allocation3], %s222_s22, %s222_s22, %s223_s23  }
  0x13   :  { %s224_s26 = smov [#allocation5]   ;;  %s171_s30 = scalar_lea.hbm %s290_s1, 256 }
  0x14   :  { %s34_s27 = sshll.u32 %s224_s26, 4  ;;  %p172_p8 = scmp.ne.s32.totalorder %s290_s1, %s171_s30  ;;  %s35_s27 = int_to_ptr.vmem [resolvable:$true] %s34_s27 }
  0x15   :  { %p175_p9 = scmp.lt.u32.totalorder %s171_s30, %s290_s1 }
  0x17   :  { %p177_p10 = pnand %p175_p9, %p172_p8 }
  0x19   :  { %180 = shalt.err (!%p177_p10)
}
  0x1a   :  { %s181_s8 = scalar_lea.vmem %s35_s27, 256  ;;  %p186_p12 = scmp.lt.s32.totalorder %s35_s27, %s35_s27 }
  0x1b   :  { %p182_p11 = scmp.ne.s32.totalorder %s35_s27, %s181_s8  ;;  %p187_p13 = scmp.lt.s32.totalorder %s181_s8, %s181_s8 }
  0x1d   :  { %p188_p0 = por %p187_p13, %p186_p12 }
  0x1f   :  { %p189_p1 = pnand %p188_p0, %p182_p11 }
  0x21   :  { %192 = shalt.err (!%p189_p1)
}
  0x22   :  { %40 = dma.hbm_to_vmem [thread:$0]  %s290_s1, 256, %s35_s27, [#allocation6], %s222_s22, %s222_s22, %s223_s23  }
  0x23   :  { %215 = dma.done.wait [#allocation3], 256  }
  0x24   :  { %216 = vsyncadd [#allocation3], 4294967040 }
  0x25   :  { %217 = dma.done.wait [#allocation6], 256  }
  0x26   :  { %218 = vsyncadd [#allocation6], 4294967040  ;;  %v225_v0 = vmov 0.0   ;;  %vm72_vm0 = vcmask 1041408   ;;  %v70_v1 = vld [vmem:[#allocation2] sm:$0xff]  ;;  %v98_v26 = vld [vmem:[#allocation5] sm:$0xff] }
  0x27   :  { %69 = vst [vmem:[#allocation7] sm:$0x1] %v225_v0  ;;  %v71_v2 = vld [vmem:[#allocation2 + $0x8] sm:$0x3]  ;;  %v99_v27 = vld [vmem:[#allocation5 + $0x8] sm:$0x3] }
  0x28   :  { %v73_v3 = vsel %vm72_vm0, %v71_v2, -inf  ;;  %v113_v42 = vld [vmem:[%s291_s2] sm:$0x1]  ;;  %s226_s11 = smov [#allocation7]  }
  0x29   :  { %v74_v4 = vmax.f32 %v70_v1, %v73_v3  ;;  %s124_s12 = sshll.u32 %s226_s11, 4  ;;  %s125_s12 = int_to_ptr.vmem [resolvable:$true] %s124_s12 }
  0x2a   :  { %s193_s13 = scalar_lea.vmem %s125_s12, 16  ;;  %s197_s14 = scalar_lea.vmem %s125_s12, 32 }
  0x2b   :  { %v75_v5 = vrot.slane %v74_v4, 4  ;;  %p194_p2 = scmp.ne.s32.totalorder %s125_s12, %s193_s13  ;;  %p198_p3 = scmp.lt.s32.totalorder %s125_s12, %s125_s12 }
  0x2c   :  { %p199_p4 = scmp.lt.s32.totalorder %s197_s14, %s193_s13 }
  0x2d   :  { %v76_v6 = vmax.f32 %v74_v4, %v75_v5 }
  0x2e   :  { %v115_v44 = vld [vmem:[#allocation7] sm:$0x1]  ;;  %p200_p5 = por %p199_p4, %p198_p3 }
  0x2f   :  { %v77_v7 = vrot.slane %v76_v6, 2 }
  0x30   :  { %p201_p6 = pnand %p200_p5, %p194_p2 }
  0x31   :  { %v78_v8 = vmax.f32 %v76_v6, %v77_v7 }
  0x33   :  { %v79_v9 = vrot.slane %v78_v8, 1 }
  0x35   :  { %v80_v10 = vmax.f32 %v78_v8, %v79_v9 }
  0x37   :  { %v81_v11 = vsub.f32 %v70_v1, %v80_v10  ;;  %v82_v12 = vsub.f32 %v71_v2, %v80_v10 }
  0x39   :  { %v83_v13 = vmul.f32 1.442695, %v81_v11  ;;  %v85_v14 = vmul.f32 1.442695, %v82_v12 }
  0x3b   :  { %143 = vpow2.f32 %v83_v13 }
  0x3c   :  { %145 = vpow2.f32 %v85_v14 }
  0x45   :  { %v144_v15 = vpop.eup %143 }
  0x46   :  { %v146_v16 = vpop.eup %145 }
  0x47   :  { %v87_v17 = vsel %vm72_vm0, %v146_v16, 0.0 }
  0x48   :  { %v88_v18 = vadd.f32 %v144_v15, %v87_v17 }
  0x4a   :  { %v89_v19 = vrot.slane %v88_v18, 4 }
  0x4c   :  { %v90_v20 = vadd.f32 %v89_v19, %v88_v18 }
  0x4e   :  { %v91_v21 = vrot.slane %v90_v20, 2 }
  0x50   :  { %v92_v22 = vadd.f32 %v91_v21, %v90_v20 }
  0x52   :  { %v93_v23 = vrot.slane %v92_v22, 1 }
  0x54   :  { %v94_v24 = vadd.f32 %v93_v23, %v92_v22 }
  0x56   :  { %147 = vrcp.f32 %v94_v24 }
  0x60   :  { %v148_v25 = vpop.eup %147 }
  0x61   :  { %v96_v28 = vmul.f32 %v148_v25, %v144_v15  ;;  %v97_v29 = vmul.f32 %v148_v25, %v146_v16 }
  0x63   :  { %v100_v30 = vsub.f32 %v96_v28, %v98_v26  ;;  %v101_v31 = vsub.f32 %v97_v29, %v99_v27 }
  0x65   :  { %v102_v32 = vmul.f32 %v100_v30, %v100_v30  ;;  %v103_v33 = vmul.f32 %v101_v31, %v101_v31 }
  0x67   :  { %v104_v34 = vsel %vm72_vm0, %v103_v33, 0.0 }
  0x68   :  { %v105_v35 = vadd.f32 %v104_v34, %v102_v32 }
  0x6a   :  { %v106_v36 = vrot.slane %v105_v35, 4 }
  0x6c   :  { %v107_v37 = vadd.f32 %v106_v36, %v105_v35 }
  0x6e   :  { %v108_v38 = vrot.slane %v107_v37, 2 }
  0x70   :  { %v109_v39 = vadd.f32 %v108_v38, %v107_v37 }
  0x72   :  { %v110_v40 = vrot.slane %v109_v39, 1 }
  0x74   :  { %v111_v41 = vadd.f32 %v110_v40, %v109_v39 }
  0x76   :  { %v112_v43 = vmul.f32 0.1, %v111_v41 }
  0x78   :  { %v114_v45 = vmul.f32 %v113_v42, %v112_v43 }
  0x7a   :  { %v116_v46 = vadd.f32 %v115_v44, %v114_v45 }
  0x7c   :  { %117 = vst [vmem:[#allocation7] sm:$0x1] %v116_v46 }
  0x7d   :  { %204 = shalt.err (!%p201_p6)
}
  0x7e   :  { %s205_s2 = scalar_lea.hbm %s292_s3, 16 }
  0x7f   :  { %p206_p7 = scmp.ne.s32.totalorder %s292_s3, %s205_s2  ;;  %p209_p8 = scmp.lt.u32.totalorder %s205_s2, %s292_s3 }
  0x81   :  { %p211_p9 = pnand %p209_p8, %p206_p7 }
  0x83   :  { %214 = shalt.err (!%p211_p9)
}
  0x84   :  { %127 = dma.vmem_to_hbm [thread:$0]  %s125_s12, 16, %s292_s3, [#allocation4]  }
  0x85   :  { %219 = dma.done.wait [#allocation4], 16  }
  0x86   :  { %220 = vsyncadd [#allocation4], 4294967280 }
  0x87   :  { %131 = vsyncpa [#allocation3], 1 }
  0x88   :  { %132 = vsyncpa [#allocation6], 1 }
  0x89   :  { %133 = vsyncpa [#allocation4], 1 }

</bundles_post_ra>
